<compile_context>
chip_gen: v6e
topology: v6e:2x2x1
jax: 0.10.0
libtpu: 0.0.40
codegen_flags: <defaults>
</compile_context>

<pallas_src>
import functools
import math

import jax
import jax.numpy as jnp
from jax.experimental import pallas as pl
from jax.experimental.pallas import tpu as pltpu


def _round_up(x, m):
    return ((x + m - 1) // m) * m


def _relu_linear_kernel(x_ref, w_ref, b_ref, o_ref, *, compute_dtype):
    # x_ref: (tm, K) f32, w_ref: (K, tn) compute_dtype (pre-cast in wrapper),
    # b_ref: (1, tn) f32, o_ref: (tm, tn) out_dtype.
    x = x_ref[...].astype(compute_dtype)                          # VPU cast only on x
    acc = jnp.dot(x, w_ref[...], preferred_element_type=jnp.float32)   # MXU, f32 acc
    o_ref[...] = jnp.maximum(acc + b_ref[...], 0.0).astype(o_ref.dtype)


def relu_layer(x, w, b, *, tile_m=512, tile_n=512,
               compute_dtype=jnp.bfloat16, out_dtype=None):
    """relu(x @ w + b), fused in a single Pallas TPU kernel.

    x: (..., K) float32
    w: (K, N)   float32   (transposed vs. torch.nn.Linear.weight)
    b: (N,)     float32
    compute_dtype: MXU operand dtype (bf16 default; pass jnp.float32 for exact parity)
    out_dtype: output dtype (defaults to x.dtype; pass bf16 to halve writeback bytes)
    """
    *lead, K = x.shape
    Kw, N = w.shape
    assert K == Kw, (K, Kw)
    out_dtype = jnp.dtype(out_dtype) if out_dtype is not None else jnp.dtype(x.dtype)

    M = math.prod(lead) if lead else 1
    if M == 0:  # empty leading dims
        return jnp.zeros((*lead, N), dtype=out_dtype)
    x2 = x.reshape(M, K)

    # Lane-pad only the small weight/bias so output stores are full unmasked vst's.
    Np = _round_up(N, 128)
    wp = jnp.pad(w, ((0, 0), (0, Np - N))) if Np != N else w
    bp = (jnp.pad(b, (0, Np - N)) if Np != N else b).reshape(1, Np).astype(jnp.float32)
    # Hoist the weight cast out of the kernel (one-time, halves weight DMA/VMEM).
    wp = wp.astype(compute_dtype)

    # Tile sizes: rows in multiples of 8 (sublane), cols in multiples of 128 (lane).
    tm = min(tile_m, _round_up(M, 8))
    tn = min(tile_n, Np)
    num_m = pl.cdiv(M, tm)     # no host-side M padding: Pallas masks the last block
    num_n = pl.cdiv(Np, tn)

    # Weight/bias are resident across the fast M axis; double-buffer only when there
    # is more than one N stripe to prefetch into.
    wb_mode = pl.Buffered(1) if num_n == 1 else pl.Buffered(2)
    wb_bufs = 1 if num_n == 1 else 2

    # VMEM budget from actual tile bytes (keeps us honest on v7x's 64 MiB VMEM).
    need = (2 * tm * K * x2.dtype.itemsize                       # x double-buffered
            + wb_bufs * K * tn * jnp.dtype(compute_dtype).itemsize
            + wb_bufs * tn * 4
            + 2 * tm * tn * out_dtype.itemsize)                  # out double-buffered
    vmem_limit = int(min(max(int(need * 1.5) + (4 << 20), 32 << 20), 100 << 20))

    kernel = functools.partial(_relu_linear_kernel, compute_dtype=compute_dtype)

    out = pl.pallas_call(
        kernel,
        out_shape=jax.ShapeDtypeStruct((M, Np), out_dtype),
        grid=(num_n, num_m),   # m fastest -> weight stripe stays resident per n-step
        in_specs=[
            pl.BlockSpec((tm, K), lambda j, i: (i, 0)),                     # activations
            pl.BlockSpec((K, tn), lambda j, i: (0, j), pipeline_mode=wb_mode),  # weight
            pl.BlockSpec((1, tn), lambda j, i: (0, j), pipeline_mode=wb_mode),  # bias
        ],
        out_specs=pl.BlockSpec((tm, tn), lambda j, i: (i, j)),
        compiler_params=pltpu.CompilerParams(
            dimension_semantics=("parallel", "parallel"),
            vmem_limit_bytes=vmem_limit,
        ),
    )(x2, wp, bp)

    if Np != N:
        out = out[:, :N]
    return out.reshape(*lead, N)


if __name__ == "__main__":
    key = jax.random.PRNGKey(0)
    kx, kw, kb, kx2, kw2, kb2 = jax.random.split(key, 6)

    # --- Small shape matching the module: (B, S, input_dim) -> hidden_dim ---
    B, S, IN_DIM, HIDDEN = 2, 8, 16, 32
    x = jax.random.normal(kx, (B, S, IN_DIM), jnp.float32)
    bound = 1.0 / math.sqrt(IN_DIM)
    # torch.nn.Linear stores weight as (out, in); here kept transposed as (in, out).
    w = jax.random.uniform(kw, (IN_DIM, HIDDEN), jnp.float32, -bound, bound)
    b = jax.random.uniform(kb, (HIDDEN,), jnp.float32, -bound, bound)

    ref = jnp.maximum(x @ w + b, 0.0)

    # Exact f32 compute path (parity with the PyTorch fp32 reference).
    out_f32 = relu_layer(x, w, b, compute_dtype=jnp.float32)
    jax.block_until_ready(out_f32)
    assert out_f32.shape == (B, S, HIDDEN)
    assert jnp.allclose(out_f32, ref, atol=1e-5, rtol=1e-5), \
        float(jnp.max(jnp.abs(out_f32 - ref)))

    # Default fast path: bf16 MXU operands, f32 accumulation, f32 output.
    out_bf = relu_layer(x, w, b)
    jax.block_until_ready(out_bf)
    assert out_bf.shape == (B, S, HIDDEN)
    assert jnp.allclose(out_bf, ref, atol=2e-2, rtol=2e-2), \
        float(jnp.max(jnp.abs(out_bf - ref)))

    # --- Larger shape exercising partial-M blocks and the N grid axis ---
    M2, K2, N2 = 600, 64, 256
    bound2 = 1.0 / math.sqrt(K2)
    x2 = jax.random.normal(kx2, (M2, K2), jnp.float32)
    w2 = jax.random.uniform(kw2, (K2, N2), jnp.float32, -bound2, bound2)
    b2 = jax.random.uniform(kb2, (N2,), jnp.float32, -bound2, bound2)
    ref2 = jnp.maximum(x2 @ w2 + b2, 0.0)

    out2 = relu_layer(x2, w2, b2, tile_m=512, tile_n=128)   # num_m=2 (partial), num_n=2
    jax.block_until_ready(out2)
    assert out2.shape == (M2, N2)
    assert jnp.allclose(out2, ref2, atol=2e-2, rtol=2e-2), \
        float(jnp.max(jnp.abs(out2 - ref2)))

    print("KERNEL_OK")
</pallas_src>

<mosaic_0001>
module attributes {stable_mosaic.version = 11 : i64} {
  func.func @_relu_linear_kernel(%arg0: i32, %arg1: i32, %arg2: memref<16x16xf32, #tpu.memory_space<vmem>>, %arg3: memref<16x128xf32, #tpu.memory_space<vmem>>, %arg4: memref<1x128xf32, #tpu.memory_space<vmem>>, %arg5: memref<16x128xf32, #tpu.memory_space<vmem>>) attributes {dimension_semantics = [#tpu.dimension_semantics<parallel>, #tpu.dimension_semantics<parallel>], iteration_bounds = array<i64: 1, 1>, scalar_prefetch = 0 : i64, scratch_operands = 0 : i64, tpu.core_type = #tpu.core_type<tc>, window_params = [{transform_indices = @transform_0, window_bounds = array<i64: 16, 16>}, {pipeline_mode = #tpu.pipeline_mode<synchronous>, transform_indices = @transform_1, window_bounds = array<i64: 16, 128>}, {pipeline_mode = #tpu.pipeline_mode<synchronous>, transform_indices = @transform_2, window_bounds = array<i64: 1, 128>}, {transform_indices = @transform_3, window_bounds = array<i64: 16, 128>}]} {
    %c0 = arith.constant 0 : index
    %c0_0 = arith.constant 0 : index
    %0 = vector.load %arg2[%c0, %c0_0] : memref<16x16xf32, #tpu.memory_space<vmem>>, vector<16x16xf32>
    %c0_1 = arith.constant 0 : index
    %c0_2 = arith.constant 0 : index
    %1 = vector.load %arg3[%c0_1, %c0_2] : memref<16x128xf32, #tpu.memory_space<vmem>>, vector<16x128xf32>
    %cst = arith.constant dense<0.000000e+00> : vector<16x128xf32>
    %2 = tpu.matmul %0, %1, %cst {dimension_numbers = #tpu.dot_dimension_numbers<[1], [0], [0], [1], [0, 0, 1, 1], [], []>} : vector<16x16xf32>, vector<16x128xf32>, vector<16x128xf32> -> vector<16x128xf32>
    %c0_3 = arith.constant 0 : index
    %c0_4 = arith.constant 0 : index
    %3 = vector.load %arg4[%c0_3, %c0_4] : memref<1x128xf32, #tpu.memory_space<vmem>>, vector<1x128xf32>
    %4 = vector.broadcast %3 : vector<1x128xf32> to vector<16x128xf32>
    %5 = arith.addf %2, %4 : vector<16x128xf32>
    %cst_5 = arith.constant 0.000000e+00 : f32
    %6 = vector.broadcast %cst_5 : f32 to vector<16x128xf32>
    %7 = arith.maximumf %5, %6 : vector<16x128xf32>
    %c0_6 = arith.constant 0 : index
    %c0_7 = arith.constant 0 : index
    %8 = vector.load %arg5[%c0_6, %c0_7] : memref<16x128xf32, #tpu.memory_space<vmem>>, vector<16x128xf32>
    tpu.vector_store %arg5[%c0_6, %c0_7], %7 {strides = array<i32>} : memref<16x128xf32, #tpu.memory_space<vmem>>, vector<16x128xf32>,
    return
  }
  func.func @transform_0(%arg0: i32, %arg1: i32) -> (i32, i32) {
    %c0_i32 = arith.constant 0 : i32
    %c0_i32_0 = arith.constant 0 : i32
    return %arg1, %c0_i32 : i32, i32
  }
  func.func @transform_1(%arg0: i32, %arg1: i32) -> (i32, i32) {
    %c0_i32 = arith.constant 0 : i32
    %c0_i32_0 = arith.constant 0 : i32
    return %c0_i32, %arg0 : i32, i32
  }
  func.func @transform_2(%arg0: i32, %arg1: i32) -> (i32, i32) {
    %c0_i32 = arith.constant 0 : i32
    %c0_i32_0 = arith.constant 0 : i32
    return %c0_i32, %arg0 : i32, i32
  }
  func.func @transform_3(%arg0: i32, %arg1: i32) -> (i32, i32) {
    %c0_i32 = arith.constant 0 : i32
    return %arg1, %arg0 : i32, i32
  }
}

</mosaic_0001>

<bundles_post_ra>
// kernel: tpu_custom_call.1
= control target key start
LH: loop header
LB: loop body
LE: loop exit
PB: predicated region body
PF: predicated region fallthrough
CT: control target
= control target key end

     0   :  { %8 = vsyncpa [#allocation3], 0  ;;  %s289_s0 = inlined_call_operand.hbm [shape: f32[16,16], index: 0, kind: input, shape index: {}]   ;;  %s290_s1 = inlined_call_operand.hbm [shape: f32[16,128], index: 1, kind: input, shape index: {}]   ;;  %s291_s2 = inlined_call_operand.vmem [shape: f32[1,128], index: 2, kind: input, shape index: {}]   ;;  %s292_s3 = inlined_call_operand.hbm [shape: f32[16,128], index: 3, kind: output, shape index: {}]  }
   0x1   :  { %9 = vsyncpa [#allocation6], 0 }
   0x2   :  { %10 = vsyncpa [#allocation4], 0  ;;  %s243_s12 = smov [#allocation2]  }
   0x3   :  { %s16_s13 = sshll.u32 %s243_s12, 4  ;;  %s17_s13 = int_to_ptr.vmem [resolvable:$true] %s16_s13 }
   0x4   :  { %s185_s14 = scalar_lea.vmem %s17_s13, 256  ;;  %p190_p1 = scmp.lt.s32.totalorder %s17_s13, %s17_s13 }
   0x5   :  { %p186_p0 = scmp.ne.s32.totalorder %s17_s13, %s185_s14  ;;  %p191_p2 = scmp.lt.s32.totalorder %s185_s14, %s185_s14 }
   0x7   :  { %p192_p3 = por %p191_p2, %p190_p1 }
   0x9   :  { %p193_p4 = pnand %p192_p3, %p186_p0 }
   0xb   :  { %196 = shalt.err (!%p193_p4)
}
   0xc   :  { %s244_s15 = smov 128   ;;  %s245_s16 = smov 8  }
   0xd   :  { %22 = dma.hbm_to_vmem [thread:$0]  %s289_s0, 256, %s17_s13, [#allocation3], %s244_s15, %s244_s15, %s245_s16  }
   0xe   :  { %s246_s19 = smov [#allocation5]  }
   0xf   :  { %s28_s20 = sshll.u32 %s246_s19, 4  ;;  %s29_s20 = int_to_ptr.vmem [resolvable:$true] %s28_s20 }
  0x10   :  { %s205_s21 = scalar_lea.vmem %s29_s20, 256  ;;  %p210_p6 = scmp.lt.s32.totalorder %s29_s20, %s29_s20 }
  0x11   :  { %p206_p5 = scmp.ne.s32.totalorder %s29_s20, %s205_s21  ;;  %p211_p7 = scmp.lt.s32.totalorder %s205_s21, %s205_s21 }
  0x13   :  { %p212_p8 = por %p211_p7, %p210_p6 }
  0x15   :  { %p213_p9 = pnand %p212_p8, %p206_p5 }
  0x17   :  { %216 = shalt.err (!%p213_p9)
}
  0x18   :  { %34 = dma.hbm_to_vmem [thread:$0]  %s290_s1, 256, %s29_s20, [#allocation6], %s244_s15, %s244_s15, %s245_s16  }
  0x19   :  { %237 = dma.done.wait [#allocation3], 256  }
  0x1a   :  { %238 = vsyncadd [#allocation3], 4294967040 }
  0x1b   :  { %239 = dma.done.wait [#allocation6], 256  }
  0x1c   :  { %240 = vsyncadd [#allocation6], 4294967040  ;;  %vm54_vm0 = vcmask 130048   ;;  %v46_v0 = vld [vmem:[#allocation5 + $0x8] sm:$0xff]  ;;  %v45_v1 = vld [vmem:[#allocation5] sm:$0xff]  ;;  %s247_s1 = smov [#allocation7]  }
  0x1d   :  { %v43_v2 = vld [vmem:[#allocation2] sm:$0xff]  ;;  %165 = vmatprep.subr.mxu0 %v46_v0  ;;  %v44_v3 = vld [vmem:[#allocation2 + $0x8] sm:$0xff]  ;;  %s145_s25 = sshll.u32 %s247_s1, 4  ;;  %s146_s25 = int_to_ptr.vmem [resolvable:$true] %s145_s25 }
  0x1e   :  { %169 = vmatprep.mubr.msk.f32.mxu0 %vm54_vm0, %v43_v2  ;;  %166 = vmatpush3.msra.mxu0 %v46_v0  ;;  %v158_v4 = vld [vmem:[%s291_s2] ss:$0 sm:$0xff]  ;;  %s217_s26 = scalar_lea.vmem %s146_s25, 256  ;;  %p222_p11 = scmp.lt.s32.totalorder %s146_s25, %s146_s25 }
  0x1f   :  { %167 = vmatprep.subr.mxu0 %v45_v1  ;;  %p218_p10 = scmp.ne.s32.totalorder %s146_s25, %s217_s26  ;;  %p223_p12 = scmp.lt.s32.totalorder %s217_s26, %s217_s26 }
  0x20   :  { %168 = vmatpush3.msra.mxu0 %v45_v1 }
  0x21   :  { %170 = vmatmul.mubr.msk.f32.vlgmr.msra.gmra.mxu0 %vm54_vm0, %v44_v3  ;;  %p224_p13 = por %p223_p12, %p222_p11 }
  0x23   :  { %p225_p0 = pnand %p224_p13, %p218_p10 }
  0xe1   :  { %v171_v5 = vpop.f32.mrf.mxu0 }
  0xe2   :  { %v133_v6 = vadd.f32 %v171_v5, %v158_v4 }
  0xe3   :  { %v127_v7 = vpop.f32.mrf.mxu0 }
  0xe4   :  { %v137_v8 = vmax.f32 %v133_v6, 0.0  ;;  %v128_v9 = vadd.f32 %v158_v4, %v127_v7 }
  0xe6   :  { %139 = vst [vmem:[#allocation7 + $0x8] sm:$0xff] %v137_v8  ;;  %v136_v10 = vmax.f32 %v128_v9, 0.0 }
  0xe8   :  { %138 = vst [vmem:[#allocation7] sm:$0xff] %v136_v10 }
  0xe9   :  { %228 = shalt.err (!%p225_p0)
}
  0xea   :  { %151 = dma.vmem_to_hbm [thread:$0]  %s146_s25, 256, %s292_s3, [#allocation4], %s244_s15, %s244_s15, %s245_s16  }
  0xeb   :  { %241 = dma.done.wait [#allocation4], 256  }
  0xec   :  { %242 = vsyncadd [#allocation4], 4294967040 }
  0xed   :  { %155 = vsyncpa [#allocation3], 1 }
  0xee   :  { %156 = vsyncpa [#allocation6], 1 }
  0xef   :  { %157 = vsyncpa [#allocation4], 1 }

</bundles_post_ra>
